<compile_context>
chip_gen: v5e
topology: v5e:2x2
jax: 0.10.0
libtpu: 0.0.40
codegen_flags: <defaults>
</compile_context>

<pallas_src>
import jax
import jax.numpy as jnp
from jax.experimental import pallas as pl
from jax.experimental.pallas import tpu as pltpu

# ---------------- problem sizes (small, consistent with the module) ----------
N  = 128   # number of coordinate points (batch)
C  = 2     # coordinate dimension (spatial coords)
M  = 16    # number of GP inducing points
D  = 16    # latent GP dimension  (module's `d`)
H1 = 64    # decoder hidden 1     (n_neurons[::-1][0])
H2 = 32    # decoder hidden 2     (n_neurons[::-1][1] == n_neurons[0])
P  = 8     # observed dimension   (module's `p`)

LENGTH_SCALE = 1.0
INV_LS2 = 1.0 / (LENGTH_SCALE * LENGTH_SCALE)

# ---------------- packed parameter slab layout (rows, 8-aligned starts) ------
SLAB_W     = 128
ROW_ZT     = 0                       # (C,  M)   inducing points, transposed
ROW_A1     = 8                       # (M,  H1)  alpha @ w1 (pre-folded)
ROW_B1     = 24                      # (1,  H1)
ROW_W2     = 32                      # (H1, H2)
ROW_B2     = 96                      # (1,  H2)
ROW_ALPHA  = 104                     # (M,  D)
ROW_WOUT   = 120                     # (H2, P)
ROW_BOUT   = 152                     # (1,  P)
SLAB_ROWS  = 160


# ------------------------------ Pallas kernel --------------------------------
def lgp_kernel(coords_ref, params_ref, x_ref, mean_ref):
    # TODO(synk): gpytorch VariationalStrategy posterior (covariance, KL) is not
    #             translatable; only a deterministic RBF sparse-GP mean is used.
    coords = coords_ref[...]                                     # (N, C)
    zt = params_ref[ROW_ZT:ROW_ZT + C, 0:M]                      # (C, M)

    # --- pairwise squared distances on the VPU (direct squared differences,
    #     always >= 0, no MXU drain, no cancellation) ---
    d0 = coords[:, 0:1] - zt[0:1, :]                             # (N, M)
    d1 = coords[:, 1:2] - zt[1:2, :]                             # (N, M)
    d2 = d0 * d0 + d1 * d1                                       # (N, M)
    k = jnp.exp(-0.5 * INV_LS2 * d2)                             # (N, M)  EUP

    # --- GP posterior mean (written directly, narrow masked store is cheap
    #     at this size) ---
    alpha = params_ref[ROW_ALPHA:ROW_ALPHA + M, 0:D]             # (M, D)
    mean_ref[...] = jnp.dot(k, alpha,
                            preferred_element_type=jnp.float32)  # (N, D)

    # --- decoder MLP; layer-1 weight pre-folded with alpha (A1 = alpha @ w1),
    #     so h does not wait on the mean matmul result ---
    a1 = params_ref[ROW_A1:ROW_A1 + M, 0:H1]                     # (M, H1)
    b1 = params_ref[ROW_B1:ROW_B1 + 1, 0:H1]                     # (1, H1)
    h = jnp.maximum(jnp.dot(k, a1, preferred_element_type=jnp.float32) + b1,
                    0.0)                                         # (N, H1)

    w2 = params_ref[ROW_W2:ROW_W2 + H1, 0:H2]                    # (H1, H2)
    b2 = params_ref[ROW_B2:ROW_B2 + 1, 0:H2]                     # (1, H2)
    h = jnp.maximum(jnp.dot(h, w2, preferred_element_type=jnp.float32) + b2,
                    0.0)                                         # (N, H2)

    # --- output layer ---
    wout = params_ref[ROW_WOUT:ROW_WOUT + H2, 0:P]               # (H2, P)
    bout = params_ref[ROW_BOUT:ROW_BOUT + 1, 0:P]                # (1, P)
    x_ref[...] = (jnp.dot(h, wout, preferred_element_type=jnp.float32)
                  + bout)                                        # (N, P)


# ---------------- one-time parameter packing (NOT in the forward path) -------
def make_packed_params(z, alpha, w1, b1, w2, b2, wout, bout):
    """Build the single f32 (SLAB_ROWS, 128) parameter slab.  Called once."""
    a1 = (alpha @ w1).astype(jnp.float32)                        # pre-fold
    slab = jnp.zeros((SLAB_ROWS, SLAB_W), jnp.float32)
    slab = slab.at[ROW_ZT:ROW_ZT + C, 0:M].set(z.T.astype(jnp.float32))
    slab = slab.at[ROW_A1:ROW_A1 + M, 0:H1].set(a1)
    slab = slab.at[ROW_B1, 0:H1].set(b1.reshape(-1).astype(jnp.float32))
    slab = slab.at[ROW_W2:ROW_W2 + H1, 0:H2].set(w2.astype(jnp.float32))
    slab = slab.at[ROW_B2, 0:H2].set(b2.reshape(-1).astype(jnp.float32))
    slab = slab.at[ROW_ALPHA:ROW_ALPHA + M, 0:D].set(alpha.astype(jnp.float32))
    slab = slab.at[ROW_WOUT:ROW_WOUT + H2, 0:P].set(wout.astype(jnp.float32))
    slab = slab.at[ROW_BOUT, 0:P].set(bout.reshape(-1).astype(jnp.float32))
    return slab


# ------------------------------ per-call forward ------------------------------
@jax.jit
def lgp_forward(coords, param_slab):
    n = coords.shape[0]
    vmem = pl.BlockSpec(memory_space=pltpu.MemorySpace.VMEM)

    flops = (6 * n * M                      # pairwise squared distances
             + 2 * n * M * D                # mean matmul
             + 2 * n * M * H1               # decoder layer 1
             + 2 * n * H1 * H2              # decoder layer 2
             + 2 * n * H2 * P)              # output layer
    bytes_accessed = (n * C * 4             # coords
                      + SLAB_ROWS * SLAB_W * 4
                      + n * (P + D) * 4)    # outputs
    cost = pl.CostEstimate(flops=flops, transcendentals=n * M,
                           bytes_accessed=bytes_accessed)

    # Grid-less: whole problem (~1 MFLOP, <100 KB) lives in VMEM in one shot.
    # (At large N: tile over rows with a "parallel" 1-D grid for the second
    #  v7x TensorCore and to stay under the 64 MiB v7x VMEM ceiling.)
    x, gp_mean = pl.pallas_call(
        lgp_kernel,
        out_shape=(jax.ShapeDtypeStruct((n, P), jnp.float32),
                   jax.ShapeDtypeStruct((n, D), jnp.float32)),
        in_specs=[vmem, vmem],
        out_specs=(vmem, vmem),
        cost_estimate=cost,
    )(coords, param_slab)
    return x, gp_mean


# ------------------------------ reference (plain JAX) -------------------------
def lgp_reference(coords, z, alpha, w1, b1, w2, b2, wout, bout):
    diff = coords[:, None, :] - z[None, :, :]
    d2 = jnp.sum(diff * diff, axis=-1)
    k = jnp.exp(-0.5 * INV_LS2 * d2)
    mean = k @ alpha
    h = jnp.maximum(mean @ w1 + b1, 0.0)
    h = jnp.maximum(h @ w2 + b2, 0.0)
    x = h @ wout + bout
    return x, mean


if __name__ == "__main__":
    key = jax.random.PRNGKey(0)
    keys = jax.random.split(key, 10)

    coords = jax.random.uniform(keys[0], (N, C), jnp.float32, -1.0, 1.0)
    z      = jax.random.uniform(keys[1], (M, C), jnp.float32, -1.0, 1.0)
    alpha  = jax.random.normal(keys[2], (M, D), jnp.float32) * 0.5
    w1     = jax.random.normal(keys[3], (D, H1), jnp.float32) * (1.0 / jnp.sqrt(D))
    b1     = jax.random.normal(keys[4], (1, H1), jnp.float32) * 0.01
    w2     = jax.random.normal(keys[5], (H1, H2), jnp.float32) * (1.0 / jnp.sqrt(H1))
    b2     = jax.random.normal(keys[6], (1, H2), jnp.float32) * 0.01
    wout   = jax.random.normal(keys[7], (H2, P), jnp.float32) * (1.0 / jnp.sqrt(H2))
    bout   = jax.random.normal(keys[8], (1, P), jnp.float32) * 0.01

    # One-time packing, outside the per-call forward path.
    param_slab = jax.block_until_ready(
        make_packed_params(z, alpha, w1, b1, w2, b2, wout, bout))

    x_recon, gp_mean = lgp_forward(coords, param_slab)
    jax.block_until_ready((x_recon, gp_mean))

    x_ref, mean_ref = lgp_reference(coords, z, alpha, w1, b1, w2, b2, wout, bout)
    assert x_recon.shape == (N, P) and gp_mean.shape == (N, D)
    assert jnp.allclose(gp_mean, mean_ref, atol=1e-4, rtol=1e-4)
    assert jnp.allclose(x_recon, x_ref, atol=1e-4, rtol=1e-4)

    print("KERNEL_OK")
</pallas_src>

<mosaic_0001>
module attributes {stable_mosaic.version = 11 : i64} {
  func.func @lgp_kernel(%arg0: memref<128x2xf32, #tpu.memory_space<vmem>>, %arg1: memref<160x128xf32, #tpu.memory_space<vmem>>, %arg2: memref<128x8xf32, #tpu.memory_space<vmem>>, %arg3: memref<128x16xf32, #tpu.memory_space<vmem>>) attributes {dimension_semantics = [], scalar_prefetch = 0 : i64, scratch_operands = 0 : i64, tpu.core_type = #tpu.core_type<tc>} {
    %c0 = arith.constant 0 : index
    %c0_0 = arith.constant 0 : index
    %0 = vector.load %arg0[%c0, %c0_0] : memref<128x2xf32, #tpu.memory_space<vmem>>, vector<128x2xf32>
    %c0_1 = arith.constant 0 : index
    %c0_2 = arith.constant 0 : index
    %1 = vector.load %arg1[%c0_1, %c0_2] : memref<160x128xf32, #tpu.memory_space<vmem>>, vector<2x16xf32>
    %2 = vector.extract_strided_slice %0 {offsets = [0, 0], sizes = [128, 1], strides = [1, 1]} : vector<128x2xf32> to vector<128x1xf32>
    %3 = vector.extract_strided_slice %1 {offsets = [0, 0], sizes = [1, 16], strides = [1, 1]} : vector<2x16xf32> to vector<1x16xf32>
    %4 = vector.broadcast %2 : vector<128x1xf32> to vector<128x16xf32>
    %5 = vector.broadcast %3 : vector<1x16xf32> to vector<128x16xf32>
    %6 = arith.subf %4, %5 : vector<128x16xf32>
    %7 = vector.extract_strided_slice %0 {offsets = [0, 1], sizes = [128, 1], strides = [1, 1]} : vector<128x2xf32> to vector<128x1xf32>
    %8 = vector.extract_strided_slice %1 {offsets = [1, 0], sizes = [1, 16], strides = [1, 1]} : vector<2x16xf32> to vector<1x16xf32>
    %9 = vector.broadcast %7 : vector<128x1xf32> to vector<128x16xf32>
    %10 = vector.broadcast %8 : vector<1x16xf32> to vector<128x16xf32>
    %11 = arith.subf %9, %10 : vector<128x16xf32>
    %12 = arith.mulf %6, %6 : vector<128x16xf32>
    %13 = arith.mulf %11, %11 : vector<128x16xf32>
    %14 = arith.addf %12, %13 : vector<128x16xf32>
    %cst = arith.constant -5.000000e-01 : f32
    %15 = vector.broadcast %cst : f32 to vector<128x16xf32>
    %16 = arith.mulf %15, %14 : vector<128x16xf32>
    %17 = math.exp %16 : vector<128x16xf32>
    %c104 = arith.constant 104 : index
    %c0_3 = arith.constant 0 : index
    %18 = vector.load %arg1[%c104, %c0_3] : memref<160x128xf32, #tpu.memory_space<vmem>>, vector<16x16xf32>
    %cst_4 = arith.constant dense<0.000000e+00> : vector<128x16xf32>
    %19 = tpu.matmul %17, %18, %cst_4 {dimension_numbers = #tpu.dot_dimension_numbers<[1], [0], [0], [1], [0, 0, 1, 1], [], []>} : vector<128x16xf32>, vector<16x16xf32>, vector<128x16xf32> -> vector<128x16xf32>
    %c0_5 = arith.constant 0 : index
    %c0_6 = arith.constant 0 : index
    %20 = vector.load %arg3[%c0_5, %c0_6] : memref<128x16xf32, #tpu.memory_space<vmem>>, vector<128x16xf32>
    tpu.vector_store %arg3[%c0_5, %c0_6], %19 {strides = array<i32>} : memref<128x16xf32, #tpu.memory_space<vmem>>, vector<128x16xf32>,
    %c8 = arith.constant 8 : index
    %c0_7 = arith.constant 0 : index
    %21 = vector.load %arg1[%c8, %c0_7] : memref<160x128xf32, #tpu.memory_space<vmem>>, vector<16x64xf32>
    %c24 = arith.constant 24 : index
    %c0_8 = arith.constant 0 : index
    %22 = vector.load %arg1[%c24, %c0_8] : memref<160x128xf32, #tpu.memory_space<vmem>>, vector<1x64xf32>
    %cst_9 = arith.constant dense<0.000000e+00> : vector<128x64xf32>
    %23 = tpu.matmul %17, %21, %cst_9 {dimension_numbers = #tpu.dot_dimension_numbers<[1], [0], [0], [1], [0, 0, 1, 1], [], []>} : vector<128x16xf32>, vector<16x64xf32>, vector<128x64xf32> -> vector<128x64xf32>
    %24 = vector.broadcast %22 : vector<1x64xf32> to vector<128x64xf32>
    %25 = arith.addf %23, %24 : vector<128x64xf32>
    %cst_10 = arith.constant 0.000000e+00 : f32
    %26 = vector.broadcast %cst_10 : f32 to vector<128x64xf32>
    %27 = arith.maximumf %25, %26 : vector<128x64xf32>
    %c32 = arith.constant 32 : index
    %c0_11 = arith.constant 0 : index
    %28 = vector.load %arg1[%c32, %c0_11] : memref<160x128xf32, #tpu.memory_space<vmem>>, vector<64x32xf32>
    %c96 = arith.constant 96 : index
    %c0_12 = arith.constant 0 : index
    %29 = vector.load %arg1[%c96, %c0_12] : memref<160x128xf32, #tpu.memory_space<vmem>>, vector<1x32xf32>
    %cst_13 = arith.constant dense<0.000000e+00> : vector<128x32xf32>
    %30 = tpu.matmul %27, %28, %cst_13 {dimension_numbers = #tpu.dot_dimension_numbers<[1], [0], [0], [1], [0, 0, 1, 1], [], []>} : vector<128x64xf32>, vector<64x32xf32>, vector<128x32xf32> -> vector<128x32xf32>
    %31 = vector.broadcast %29 : vector<1x32xf32> to vector<128x32xf32>
    %32 = arith.addf %30, %31 : vector<128x32xf32>
    %cst_14 = arith.constant 0.000000e+00 : f32
    %33 = vector.broadcast %cst_14 : f32 to vector<128x32xf32>
    %34 = arith.maximumf %32, %33 : vector<128x32xf32>
    %c120 = arith.constant 120 : index
    %c0_15 = arith.constant 0 : index
    %35 = vector.load %arg1[%c120, %c0_15] : memref<160x128xf32, #tpu.memory_space<vmem>>, vector<32x8xf32>
    %c152 = arith.constant 152 : index
    %c0_16 = arith.constant 0 : index
    %36 = vector.load %arg1[%c152, %c0_16] : memref<160x128xf32, #tpu.memory_space<vmem>>, vector<1x8xf32>
    %cst_17 = arith.constant dense<0.000000e+00> : vector<128x8xf32>
    %37 = tpu.matmul %34, %35, %cst_17 {dimension_numbers = #tpu.dot_dimension_numbers<[1], [0], [0], [1], [0, 0, 1, 1], [], []>} : vector<128x32xf32>, vector<32x8xf32>, vector<128x8xf32> -> vector<128x8xf32>
    %38 = vector.broadcast %36 : vector<1x8xf32> to vector<128x8xf32>
    %39 = arith.addf %37, %38 : vector<128x8xf32>
    %c0_18 = arith.constant 0 : index
    %c0_19 = arith.constant 0 : index
    %40 = vector.load %arg2[%c0_18, %c0_19] : memref<128x8xf32, #tpu.memory_space<vmem>>, vector<128x8xf32>
    tpu.vector_store %arg2[%c0_18, %c0_19], %39 {strides = array<i32>} : memref<128x8xf32, #tpu.memory_space<vmem>>, vector<128x8xf32>,
    return
  }
}

</mosaic_0001>

<bundles_post_ra>
// kernel: lgp_forward.1
= control target key start
LH: loop header
LB: loop body
LE: loop exit
PB: predicated region body
PF: predicated region fallthrough
CT: control target
= control target key end

     0   :  { %9 = vsyncpa [#allocation3], 0  ;;  %s984_s15 = smov [#allocation2]   ;;  %s985_s17 = smov 128   ;;  %s1336_s0 = inlined_call_operand.vmem [shape: f32[128,2], index: 0, kind: input, shape index: {}]   ;;  %s1337_s1 = inlined_call_operand.hbm [shape: f32[160,128], index: 1, kind: input, shape index: {}]   ;;  %s1338_s2 = inlined_call_operand.vmem [shape: f32[128,8], index: 2, kind: output, shape index: {0}]   ;;  %s1339_s3 = inlined_call_operand.vmem [shape: f32[128,16], index: 3, kind: output, shape index: {1}]  }
   0x1   :  { %s16_s14 = sshll.u32 %s1337_s1, 4  ;;  %s18_s16 = sshll.u32 %s984_s15, 4  ;;  %s17_s14 = int_to_ptr.hbm [resolvable:$true] %s16_s14  ;;  %s19_s16 = int_to_ptr.vmem [resolvable:$true] %s18_s16 }
   0x2   :  { %s986_s18 = smov 8  }
   0x3   :  { %24 = dma.hbm_to_vmem [thread:$0]  %s17_s14, 2560, %s19_s16, [#allocation3], %s985_s17, %s985_s17, %s986_s18  }
   0x4   :  { %982 = dma.done.wait [#allocation3], 2560  }
   0x5   :  { %983 = vsyncadd [#allocation3], 4294964736  ;;  %v987_v0 = vmov 0   ;;  %v30_v1 = vld [vmem:[%s1336_s0 + $0x8] sm:$0xff]  ;;  %v29_v2 = vld [vmem:[%s1336_s0] sm:$0xff]  ;;  %v988_v4 = vmov 1  }
   0x6   :  { %902 = vset.pattern.permute.xlu1 %v987_v0  ;;  %900 = vset.pattern.permute.xlu0 %v987_v0  ;;  %v31_v3 = vld [vmem:[%s1336_s0 + $0x10] sm:$0xff]  ;;  %v32_v5 = vld [vmem:[%s1336_s0 + $0x18] sm:$0xff]  ;;  %v33_v6 = vld [vmem:[%s1336_s0 + $0x20] sm:$0xff]  ;;  %vm322_vm0 = vcmask 130048   ;;  %vm547_vm1 = vcmask 523264   ;;  %vm683_vm2 = vcmask 261120  }
   0x7   :  { %904 = vset.pattern.permute.xlu2 %v987_v0  ;;  %53 = vperm.xlu1 %902, %v30_v1   ;;  %v35_v7 = vld [vmem:[%s1336_s0 + $0x30] sm:$0xff]  ;;  %v34_v8 = vld [vmem:[%s1336_s0 + $0x28] sm:$0xff]  ;;  %v36_v10 = vld [vmem:[%s1336_s0 + $0x38] sm:$0xff]  ;;  %vm797_vm3 = vcmask 64512  }
   0x8   :  { %48 = vperm.xlu0 %900, %v29_v2   ;;  %58 = vperm.xlu2 %904, %v31_v3   ;;  %v38_v9 = vld [vmem:[%s1336_s0 + $0x48] sm:$0xff]  ;;  %v40_v11 = vld [vmem:[%s1336_s0 + $0x58] sm:$0xff]  ;;  %v37_v12 = vld [vmem:[%s1336_s0 + $0x40] sm:$0xff] }
   0x9   :  { %v39_v13 = vld [vmem:[%s1336_s0 + $0x50] sm:$0xff]  ;;  %v41_v15 = vld [vmem:[%s1336_s0 + $0x60] sm:$0xff]  ;;  %v42_v16 = vld [vmem:[%s1336_s0 + $0x68] sm:$0xff] }
   0xa   :  { %v43_v14 = vld [vmem:[%s1336_s0 + $0x70] sm:$0xff]  ;;  %v44_v17 = vld [vmem:[%s1336_s0 + $0x78] sm:$0xff]  ;;  %v320_v20 = vld [vmem:[#allocation2 + $0x68] sm:$0xff] }
   0xb   :  { %v321_v18 = vld [vmem:[#allocation2 + $0x70] sm:$0xff]  ;;  %v452_v21 = vld [vmem:[#allocation2 + $0x8] sm:$0xff]  ;;  %v45_v24 = vld [vmem:[#allocation2] sm:$0x3] }
   0xc   :  { %v453_v19 = vld [vmem:[#allocation2 + $0x10] sm:$0xff]  ;;  %385 = vmatpush.msra.mxu0 %v321_v18  ;;  %v1072_v26 = vperm.slane %v45_v24, 0  ;;  %v544_v27 = vld [vmem:[#allocation2 + $0x58] sm:$0xff]  ;;  %v1074_v28 = vperm.slane %v45_v24, 1 }
   0xd   :  { %470 = vmatpush.msra.mxu1 %v453_v19  ;;  %887 = vmatpush.msra.mxu2 %v544_v27  ;;  %v543_v49 = vld [vmem:[#allocation2 + $0x50] sm:$0xff] }
   0xe   :  { %386 = vmatpush.msra.mxu0 %v320_v20 }
   0xf   :  { %903 = vset.pattern.permute.xlu1 %v988_v4  ;;  %471 = vmatpush.msra.mxu1 %v452_v21 }
  0x10   :  { %901 = vset.pattern.permute.xlu0 %v988_v4  ;;  %148 = vperm.xlu1 %903, %v30_v1  }
  0x11   :  { %144 = vperm.xlu0 %901, %v29_v2   ;;  %905 = vset.pattern.permute.xlu2 %v988_v4 }
  0x12   :  { %152 = vperm.xlu2 %905, %v31_v3   ;;  %604 = vmatpush.msrb.mxu0 %v544_v27  ;;  %v541_v27 = vld [vmem:[#allocation2 + $0x40] sm:$0xff] }
  0x13   :  { %888 = vmatpush.msra.mxu2 %v543_v49 }
  0x14   :  { %605 = vmatpush.msrb.mxu0 %v543_v49 }
  0x18   :  { %906 = vset.pattern.permute.xlu1 %v987_v0 }
  0x19   :  { %907 = vset.pattern.permute.xlu0 %v987_v0  ;;  %63 = vperm.xlu1 %906, %v32_v5  }
  0x1a   :  { %68 = vperm.xlu0 %907, %v33_v6   ;;  %156 = vperm.xlu2 %905, %v32_v5  }
  0x21   :  { %908 = vset.pattern.permute.xlu1 %v988_v4 }
  0x22   :  { %910 = vset.pattern.permute.xlu0 %v988_v4  ;;  %160 = vperm.xlu1 %908, %v33_v6   ;;  %v542_v6 = vld [vmem:[#allocation2 + $0x48] sm:$0xff] }
  0x23   :  { %168 = vperm.xlu0 %910, %v35_v7   ;;  %909 = vset.pattern.permute.xlu2 %v987_v0 }
  0x24   :  { %73 = vperm.xlu2 %909, %v34_v8   ;;  %606 = vmatpush.msrb.mxu0 %v542_v6 }
  0x25   :  { %889 = vmatpush.msra.mxu2 %v542_v6  ;;  %v539_v6 = vld [vmem:[#allocation2 + $0x30] sm:$0xff] }
  0x26   :  { %607 = vmatpush.msrb.mxu0 %v541_v27 }
  0x27   :  { %890 = vmatpush.msra.mxu2 %v541_v27 }
  0x2a   :  { %164 = vperm.xlu1 %908, %v34_v8  }
  0x2b   :  { %913 = vset.pattern.permute.xlu0 %v987_v0 }
  0x2c   :  { %93 = vperm.xlu0 %913, %v38_v9   ;;  %78 = vperm.xlu2 %909, %v35_v7  }
  0x32   :  { %911 = vset.pattern.permute.xlu1 %v987_v0 }
  0x33   :  { %83 = vperm.xlu1 %911, %v36_v10  }
  0x34   :  { %916 = vset.pattern.permute.xlu0 %v988_v4  ;;  %912 = vset.pattern.permute.xlu2 %v988_v4 }
  0x35   :  { %188 = vperm.xlu0 %916, %v40_v11   ;;  %172 = vperm.xlu2 %912, %v36_v10  }
  0x3b   :  { %88 = vperm.xlu1 %911, %v37_v12  }
  0x3d   :  { %919 = vset.pattern.permute.xlu0 %v987_v0  ;;  %176 = vperm.xlu2 %912, %v37_v12  }
  0x3e   :  { %118 = vperm.xlu0 %919, %v43_v14  }
  0x43   :  { %914 = vset.pattern.permute.xlu1 %v988_v4 }
  0x44   :  { %180 = vperm.xlu1 %914, %v38_v9  }
  0x45   :  { %915 = vset.pattern.permute.xlu2 %v987_v0 }
  0x46   :  { %98 = vperm.xlu2 %915, %v39_v13   ;;  %922 = vset.pattern.permute.xlu0 %v988_v4 }
  0x4c   :  { %184 = vperm.xlu1 %914, %v39_v13  }
  0x4e   :  { %103 = vperm.xlu2 %915, %v40_v11  }
  0x54   :  { %917 = vset.pattern.permute.xlu1 %v987_v0 }
  0x55   :  { %108 = vperm.xlu1 %917, %v41_v15  }
  0x56   :  { %918 = vset.pattern.permute.xlu2 %v988_v4 }
  0x57   :  { %192 = vperm.xlu2 %918, %v41_v15  }
  0x5d   :  { %113 = vperm.xlu1 %917, %v42_v16  }
  0x5f   :  { %196 = vperm.xlu2 %918, %v42_v16  }
  0x62   :  { %v59_v25 = vpop.permute.xlu2 %58 }
  0x63   :  { %v129_v41 = vsub.f32 %v59_v25, %v1072_v26 }
  0x65   :  { %920 = vset.pattern.permute.xlu1 %v988_v4  ;;  %v226_v47 = vmul.f32 %v129_v41, %v129_v41 }
  0x66   :  { %200 = vperm.xlu1 %920, %v43_v14  }
  0x67   :  { %921 = vset.pattern.permute.xlu2 %v987_v0 }
  0x68   :  { %123 = vperm.xlu2 %921, %v44_v17  }
  0x6c   :  { %v153_v37 = vpop.permute.xlu2 %152 }
  0x6d   :  { %v210_v43 = vsub.f32 %v153_v37, %v1074_v28 }
  0x6e   :  { %204 = vperm.xlu1 %920, %v44_v17  }
  0x6f   :  { %v242_v48 = vmul.f32 %v210_v43, %v210_v43 }
  0x71   :  { %v258_v52 = vadd.f32 %v242_v48, %v226_v47 }
  0x73   :  { %v274_v59 = vmul.f32 -0.5, %v258_v52 }
  0x74   :  { %v157_v51 = vpop.permute.xlu2 %156 }
  0x75   :  { %v211_v54 = vsub.f32 %v157_v51, %v1074_v28  ;;  %v292_v1 = vmul.f32 1.442695, %v274_v59 }
  0x77   :  { %v243_v60 = vmul.f32 %v211_v54, %v211_v54 }
  0x79   :  { %v54_v23 = vpop.permute.xlu1 %53 }
  0x7a   :  { %v49_v22 = vpop.permute.xlu0 %48  ;;  %v128_v30 = vsub.f32 %v54_v23, %v1072_v26 }
  0x7b   :  { %v127_v29 = vsub.f32 %v49_v22, %v1072_v26 }
  0x7c   :  { %v225_v38 = vmul.f32 %v128_v30, %v128_v30 }
  0x7d   :  { %v224_v35 = vmul.f32 %v127_v29, %v127_v29 }
  0x7e   :  { %v74_v0 = vpop.permute.xlu2 %73 }
  0x7f   :  { %v132_v11 = vsub.f32 %v74_v0, %v1072_v26 }
  0x81   :  { %v229_v16 = vmul.f32 %v132_v11, %v132_v11 }
  0x82   :  { %v149_v31 = vpop.permute.xlu1 %148 }
  0x83   :  { %v145_v32 = vpop.permute.xlu0 %144  ;;  %v209_v33 = vsub.f32 %v149_v31, %v1074_v28 }
  0x84   :  { %v208_v34 = vsub.f32 %v145_v32, %v1074_v28 }
  0x85   :  { %v241_v39 = vmul.f32 %v209_v33, %v209_v33 }
  0x86   :  { %v240_v36 = vmul.f32 %v208_v34, %v208_v34  ;;  %v79_v13 = vpop.permute.xlu2 %78 }
  0x87   :  { %v257_v44 = vadd.f32 %v241_v39, %v225_v38  ;;  %v133_v22 = vsub.f32 %v79_v13, %v1072_v26 }
  0x88   :  { %v256_v40 = vadd.f32 %v240_v36, %v224_v35 }
  0x89   :  { %v273_v50 = vmul.f32 -0.5, %v257_v44  ;;  %v230_v30 = vmul.f32 %v133_v22, %v133_v22 }
  0x8a   :  { %v272_v42 = vmul.f32 -0.5, %v256_v40 }
  0x8b   :  { %v64_v46 = vpop.permute.xlu1 %63  ;;  %v290_v53 = vmul.f32 1.442695, %v273_v50  ;;  %v540_v50 = vld [vmem:[#allocation2 + $0x38] sm:$0xff] }
  0x8c   :  { %v288_v45 = vmul.f32 1.442695, %v272_v42  ;;  %v130_v55 = vsub.f32 %v64_v46, %v1072_v26  ;;  %v69_v58 = vpop.permute.xlu0 %68  ;;  %608 = vmatpush.msrb.mxu0 %v540_v50  ;;  %891 = vmatpush.msra.mxu2 %v540_v50  ;;  %v537_v50 = vld [vmem:[#allocation2 + $0x20] sm:$0xff] }
  0x8d   :  { %v131_v63 = vsub.f32 %v69_v58, %v1072_v26 }
  0x8e   :  { %926 = vpow2.f32 %v288_v45  ;;  %v227_v61 = vmul.f32 %v130_v55, %v130_v55  ;;  %609 = vmatpush.msrb.mxu0 %v539_v6  ;;  %892 = vmatpush.msra.mxu2 %v539_v6 }
  0x8f   :  { %928 = vpow2.f32 %v290_v53  ;;  %v228_v5 = vmul.f32 %v131_v63, %v131_v63  ;;  %v173_v25 = vpop.permute.xlu2 %172 }
  0x90   :  { %v259_v2 = vadd.f32 %v243_v60, %v227_v61  ;;  %930 = vpow2.f32 %v292_v1  ;;  %v215_v32 = vsub.f32 %v173_v25, %v1074_v28 }
  0x92   :  { %v275_v7 = vmul.f32 -0.5, %v259_v2  ;;  %v247_v38 = vmul.f32 %v215_v32, %v215_v32 }
  0x94   :  { %v927_v56 = vpop.eup %926  ;;  %v161_v57 = vpop.permute.xlu1 %160  ;;  %v294_v10 = vmul.f32 1.442695, %v275_v7 }
  0x95   :  { %823 = vmatmul.msk.f32.vlgmr.msra.gmra.mxu0 %vm322_vm0, %v927_v56  ;;  %839 = vmatmul.msk.f32.vlgmr.msra.gmra.mxu1 %vm322_vm0, %v927_v56  ;;  %v212_v62 = vsub.f32 %v161_v57, %v1074_v28  ;;  %v929_v3 = vpop.eup %928  ;;  %v169_v18 = vpop.permute.xlu0 %168 }
  0x96   :  { %v931_v14 = vpop.eup %930  ;;  %932 = vpow2.f32 %v294_v10  ;;  %v214_v23 = vsub.f32 %v169_v18, %v1074_v28 }
  0x97   :  { %v244_v4 = vmul.f32 %v212_v62, %v212_v62  ;;  %v177_v41 = vpop.permute.xlu2 %176 }
  0x98   :  { %v246_v31 = vmul.f32 %v214_v23, %v214_v23  ;;  %v216_v44 = vsub.f32 %v177_v41, %v1074_v28 }
  0x99   :  { %v260_v9 = vadd.f32 %v244_v4, %v228_v5 }
  0x9a   :  { %v262_v36 = vadd.f32 %v246_v31, %v230_v30  ;;  %v248_v51 = vmul.f32 %v216_v44, %v216_v44  ;;  %v538_v30 = vld [vmem:[#allocation2 + $0x28] sm:$0xff] }
  0x9b   :  { %v276_v15 = vmul.f32 -0.5, %v260_v9  ;;  %610 = vmatpush.msrb.mxu0 %v538_v30  ;;  %893 = vmatpush.msra.mxu2 %v538_v30 }
  0x9c   :  { %v165_v8 = vpop.permute.xlu1 %164  ;;  %v933_v24 = vpop.eup %932  ;;  %v278_v40 = vmul.f32 -0.5, %v262_v36 }
  0x9d   :  { %824 = vmatmul.msk.f32.gmra.mxu0 %vm322_vm0, %v929_v3  ;;  %840 = vmatmul.msk.f32.gmra.mxu1 %vm322_vm0, %v929_v3  ;;  %v213_v12 = vsub.f32 %v165_v8, %v1074_v28  ;;  %v296_v19 = vmul.f32 1.442695, %v276_v15 }
  0x9e   :  { %v300_v43 = vmul.f32 1.442695, %v278_v40  ;;  %v94_v49 = vpop.permute.xlu0 %93  ;;  %611 = vmatpush.msrb.mxu0 %v537_v50  ;;  %894 = vmatpush.msra.mxu2 %v537_v50 }
  0x9f   :  { %v245_v17 = vmul.f32 %v213_v12, %v213_v12  ;;  %934 = vpow2.f32 %v296_v19  ;;  %v136_v55 = vsub.f32 %v94_v49, %v1072_v26 }
  0xa0   :  { %v99_v56 = vpop.permute.xlu2 %98 }
  0xa1   :  { %v261_v21 = vadd.f32 %v245_v17, %v229_v16  ;;  %v233_v60 = vmul.f32 %v136_v55, %v136_v55  ;;  %v137_v2 = vsub.f32 %v99_v56, %v1072_v26 }
  0xa3   :  { %v277_v29 = vmul.f32 -0.5, %v261_v21  ;;  %v234_v7 = vmul.f32 %v137_v2, %v137_v2 }
  0xa5   :  { %825 = vmatmul.msk.f32.gmra.mxu0 %vm322_vm0, %v931_v14  ;;  %841 = vmatmul.msk.f32.gmra.mxu1 %vm322_vm0, %v931_v14  ;;  %v84_v20 = vpop.permute.xlu1 %83  ;;  %v935_v34 = vpop.eup %934  ;;  %v298_v35 = vmul.f32 1.442695, %v277_v29 }
  0xa6   :  { %v134_v33 = vsub.f32 %v84_v20, %v1072_v26 }
  0xa7   :  { %936 = vpow2.f32 %v298_v35  ;;  %v189_v9 = vpop.permute.xlu0 %188 }
  0xa8   :  { %v231_v39 = vmul.f32 %v134_v33, %v134_v33  ;;  %938 = vpow2.f32 %v300_v43  ;;  %v104_v4 = vpop.permute.xlu2 %103  ;;  %v219_v14 = vsub.f32 %v189_v9, %v1074_v28 }
  0xa9   :  { %v138_v13 = vsub.f32 %v104_v4, %v1072_v26 }
  0xaa   :  { %v263_v42 = vadd.f32 %v247_v38, %v231_v39  ;;  %v251_v19 = vmul.f32 %v219_v14, %v219_v14 }
  0xab   :  { %v235_v18 = vmul.f32 %v138_v13, %v138_v13 }
  0xac   :  { %v279_v47 = vmul.f32 -0.5, %v263_v42 }
  0xad   :  { %826 = vmatmul.msk.f32.gmra.mxu0 %vm322_vm0, %v933_v24  ;;  %842 = vmatmul.msk.f32.gmra.mxu1 %vm322_vm0, %v933_v24  ;;  %v89_v37 = vpop.permute.xlu1 %88  ;;  %v937_v46 = vpop.eup %936  ;;  %v267_v24 = vadd.f32 %v251_v19, %v235_v18 }
  0xae   :  { %v135_v45 = vsub.f32 %v89_v37, %v1072_v26  ;;  %v302_v53 = vmul.f32 1.442695, %v279_v47  ;;  %v939_v58 = vpop.eup %938 }
  0xaf   :  { %v283_v31 = vmul.f32 -0.5, %v267_v24 }
  0xb0   :  { %v232_v52 = vmul.f32 %v135_v45, %v135_v45  ;;  %940 = vpow2.f32 %v302_v53  ;;  %v119_v40 = vpop.permute.xlu0 %118 }
  0xb1   :  { %v193_v16 = vpop.permute.xlu2 %192  ;;  %v141_v45 = vsub.f32 %v119_v40, %v1072_v26 }
  0xb2   :  { %v264_v57 = vadd.f32 %v248_v51, %v232_v52  ;;  %v220_v20 = vsub.f32 %v193_v16, %v1074_v28 }
  0xb3   :  { %v238_v49 = vmul.f32 %v141_v45, %v141_v45 }
  0xb4   :  { %v280_v61 = vmul.f32 -0.5, %v264_v57  ;;  %v252_v27 = vmul.f32 %v220_v20, %v220_v20 }
  0xb5   :  { %827 = vmatmul.msk.f32.gmra.mxu0 %vm322_vm0, %v935_v34  ;;  %843 = vmatmul.msk.f32.gmra.mxu1 %vm322_vm0, %v935_v34  ;;  %v310_v34 = vmul.f32 1.442695, %v283_v31 }
  0xb6   :  { %v181_v48 = vpop.permute.xlu1 %180  ;;  %v941_v0 = vpop.eup %940  ;;  %v304_v1 = vmul.f32 1.442695, %v280_v61 }
  0xb7   :  { %v217_v54 = vsub.f32 %v181_v48, %v1074_v28 }
  0xb8   :  { %942 = vpow2.f32 %v304_v1 }
  0xb9   :  { %v249_v59 = vmul.f32 %v217_v54, %v217_v54  ;;  %v197_v32 = vpop.permute.xlu2 %196 }
  0xba   :  { %v221_v35 = vsub.f32 %v197_v32, %v1074_v28 }
  0xbb   :  { %v265_v63 = vadd.f32 %v249_v59, %v233_v60 }
  0xbc   :  { %v253_v41 = vmul.f32 %v221_v35, %v221_v35 }
  0xbd   :  { %828 = vmatmul.msk.f32.gmra.mxu0 %vm322_vm0, %v937_v46  ;;  %844 = vmatmul.msk.f32.gmra.mxu1 %vm322_vm0, %v937_v46  ;;  %v281_v5 = vmul.f32 -0.5, %v265_v63 }
  0xbe   :  { %v185_v62 = vpop.permute.xlu1 %184  ;;  %v943_v15 = vpop.eup %942 }
  0xbf   :  { %v218_v3 = vsub.f32 %v185_v62, %v1074_v28  ;;  %v306_v10 = vmul.f32 1.442695, %v281_v5 }
  0xc1   :  { %v250_v8 = vmul.f32 %v218_v3, %v218_v3  ;;  %944 = vpow2.f32 %v306_v10  ;;  %v1140_v3 = vld [vmem:[#allocation2 + $0x18] ss:$0 sm:$0xff] }
  0xc2   :  { %v124_v52 = vpop.permute.xlu2 %123 }
  0xc3   :  { %v266_v12 = vadd.f32 %v250_v8, %v234_v7  ;;  %v142_v57 = vsub.f32 %v124_v52, %v1072_v26 }
  0xc5   :  { %829 = vmatmul.msk.f32.gmra.mxu0 %vm322_vm0, %v939_v58  ;;  %845 = vmatmul.msk.f32.gmra.mxu1 %vm322_vm0, %v939_v58  ;;  %v282_v17 = vmul.f32 -0.5, %v266_v12  ;;  %v239_v60 = vmul.f32 %v142_v57, %v142_v57 }
  0xc7   :  { %v109_v11 = vpop.permute.xlu1 %108  ;;  %v945_v22 = vpop.eup %944  ;;  %v308_v23 = vmul.f32 1.442695, %v282_v17 }
  0xc8   :  { %v139_v21 = vsub.f32 %v109_v11, %v1072_v26 }
  0xc9   :  { %946 = vpow2.f32 %v308_v23 }
  0xca   :  { %v236_v29 = vmul.f32 %v139_v21, %v139_v21  ;;  %948 = vpow2.f32 %v310_v34 }
  0xcc   :  { %v268_v33 = vadd.f32 %v252_v27, %v236_v29 }
  0xcd   :  { %830 = vmatmul.msk.f32.gmra.mxu0 %vm322_vm0, %v941_v0  ;;  %846 = vmatmul.msk.f32.gmra.mxu1 %vm322_vm0, %v941_v0 }
  0xce   :  { %v284_v38 = vmul.f32 -0.5, %v268_v33 }
  0xcf   :  { %v114_v25 = vpop.permute.xlu1 %113  ;;  %v947_v37 = vpop.eup %946 }
  0xd0   :  { %v140_v36 = vsub.f32 %v114_v25, %v1072_v26  ;;  %v312_v43 = vmul.f32 1.442695, %v284_v38  ;;  %v949_v47 = vpop.eup %948 }
  0xd2   :  { %v237_v42 = vmul.f32 %v140_v36, %v140_v36  ;;  %950 = vpow2.f32 %v312_v43 }
  0xd4   :  { %v269_v46 = vadd.f32 %v253_v41, %v237_v42 }
  0xd5   :  { %831 = vmatmul.msk.f32.gmra.mxu0 %vm322_vm0, %v943_v15  ;;  %847 = vmatmul.msk.f32.gmra.mxu1 %vm322_vm0, %v943_v15 }
  0xd6   :  { %v285_v51 = vmul.f32 -0.5, %v269_v46 }
  0xd8   :  { %v201_v39 = vpop.permute.xlu1 %200  ;;  %v951_v55 = vpop.eup %950  ;;  %v314_v56 = vmul.f32 1.442695, %v285_v51 }
  0xd9   :  { %v222_v44 = vsub.f32 %v201_v39, %v1074_v28 }
  0xda   :  { %952 = vpow2.f32 %v314_v56 }
  0xdb   :  { %v254_v48 = vmul.f32 %v222_v44, %v222_v44 }
  0xdd   :  { %832 = vmatmul.msk.f32.gmra.mxu0 %vm322_vm0, %v945_v22  ;;  %848 = vmatmul.msk.f32.gmra.mxu1 %vm322_vm0, %v945_v22  ;;  %v270_v54 = vadd.f32 %v254_v48, %v238_v49 }
  0xdf   :  { %v286_v59 = vmul.f32 -0.5, %v270_v54  ;;  %v680_v54 = vld [vmem:[#allocation2 + $0x90] sm:$0xff] }
  0xe0   :  { %v205_v53 = vpop.permute.xlu1 %204  ;;  %v953_v0 = vpop.eup %952  ;;  %744 = vmatpush.msra.mxu3 %v680_v54 }
  0xe1   :  { %v223_v58 = vsub.f32 %v205_v53, %v1074_v28  ;;  %v316_v62 = vmul.f32 1.442695, %v286_v59 }
  0xe3   :  { %v255_v61 = vmul.f32 %v223_v58, %v223_v58  ;;  %954 = vpow2.f32 %v316_v62  ;;  %v679_v58 = vld [vmem:[#allocation2 + $0x88] sm:$0xff] }
  0xe4   :  { %745 = vmatpush.msra.mxu3 %v679_v58 }
  0xe5   :  { %833 = vmatmul.msk.f32.gmra.mxu0 %vm322_vm0, %v947_v37  ;;  %849 = vmatmul.msk.f32.gmra.mxu1 %vm322_vm0, %v947_v37  ;;  %v271_v63 = vadd.f32 %v255_v61, %v239_v60  ;;  %v678_v60 = vld [vmem:[#allocation2 + $0x80] sm:$0xff]  ;;  %v677_v61 = vld [vmem:[#allocation2 + $0x78] sm:$0xff] }
  0xe6   :  { %746 = vmatpush.msra.mxu3 %v678_v60 }
  0xe7   :  { %v287_v1 = vmul.f32 -0.5, %v271_v63 }
  0xe8   :  { %747 = vmatpush.msra.mxu3 %v677_v61 }
  0xe9   :  { %v955_v26 = vpop.eup %954  ;;  %v318_v2 = vmul.f32 1.442695, %v287_v1 }
  0xeb   :  { %956 = vpow2.f32 %v318_v2 }
  0xed   :  { %834 = vmatmul.msk.f32.gmra.mxu0 %vm322_vm0, %v949_v47  ;;  %850 = vmatmul.msk.f32.gmra.mxu1 %vm322_vm0, %v949_v47 }
  0xf1   :  { %v957_v28 = vpop.eup %956 }
  0xf5   :  { %835 = vmatmul.msk.f32.gmra.mxu0 %vm322_vm0, %v951_v55  ;;  %851 = vmatmul.msk.f32.gmra.mxu1 %vm322_vm0, %v951_v55 }
  0xfd   :  { %836 = vmatmul.msk.f32.gmra.mxu0 %vm322_vm0, %v953_v0  ;;  %852 = vmatmul.msk.f32.gmra.mxu1 %vm322_vm0, %v953_v0 }
 0x105   :  { %837 = vmatmul.msk.f32.gmra.mxu0 %vm322_vm0, %v955_v26  ;;  %853 = vmatmul.msk.f32.gmra.mxu1 %vm322_vm0, %v955_v26 }
 0x10d   :  { %838 = vmatmul.msk.f32.gmra.mxu0 %vm322_vm0, %v957_v28  ;;  %854 = vmatmul.msk.f32.gmra.mxu1 %vm322_vm0, %v957_v28 }
 0x112   :  { %v388_v4 = vpop.f32.mrf.mxu0  ;;  %v473_v5 = vpop.f32.mrf.mxu1 }
 0x113   :  { %436 = vst.msk [vmem:[%s1339_s3] sm:$0xff] %vm322_vm0, %v388_v4  ;;  %v474_v6 = vadd.f32 %v1140_v3, %v473_v5 }
 0x115   :  { %v521_v7 = vmax.f32 %v474_v6, 0.0 }
 0x117   :  { %855 = vmatmul.msk.f32.vlgmr.msrb.gmra.mxu0 %vm547_vm1, %v521_v7 }
 0x11a   :  { %v391_v8 = vpop.f32.mrf.mxu0  ;;  %v476_v9 = vpop.f32.mrf.mxu1 }
 0x11b   :  { %437 = vst.msk [vmem:[%s1339_s3 + $0x8] sm:$0xff] %vm322_vm0, %v391_v8  ;;  %v477_v10 = vadd.f32 %v1140_v3, %v476_v9  ;;  %v1238_v9 = vld [vmem:[#allocation2 + $0x60] ss:$0 sm:$0xff] }
 0x11d   :  { %v522_v11 = vmax.f32 %v477_v10, 0.0 }
 0x11f   :  { %856 = vmatmul.msk.f32.vlgmr.msra.gmra.mxu2 %vm547_vm1, %v522_v11 }
 0x122   :  { %v394_v12 = vpop.f32.mrf.mxu0  ;;  %v479_v13 = vpop.f32.mrf.mxu1 }
 0x123   :  { %438 = vst.msk [vmem:[%s1339_s3 + $0x10] sm:$0xff] %vm322_vm0, %v394_v12  ;;  %v480_v14 = vadd.f32 %v1140_v3, %v479_v13 }
 0x125   :  { %v523_v15 = vmax.f32 %v480_v14, 0.0 }
 0x127   :  { %857 = vmatmul.msk.f32.gmra.mxu2 %vm547_vm1, %v523_v15 }
 0x12a   :  { %v397_v16 = vpop.f32.mrf.mxu0  ;;  %v482_v17 = vpop.f32.mrf.mxu1 }
 0x12b   :  { %439 = vst.msk [vmem:[%s1339_s3 + $0x18] sm:$0xff] %vm322_vm0, %v397_v16  ;;  %v483_v18 = vadd.f32 %v1140_v3, %v482_v17 }
 0x12d   :  { %v524_v19 = vmax.f32 %v483_v18, 0.0 }
 0x12f   :  { %858 = vmatmul.msk.f32.gmra.mxu2 %vm547_vm1, %v524_v19 }
 0x132   :  { %v400_v20 = vpop.f32.mrf.mxu0  ;;  %v485_v21 = vpop.f32.mrf.mxu1 }
 0x133   :  { %440 = vst.msk [vmem:[%s1339_s3 + $0x20] sm:$0xff] %vm322_vm0, %v400_v20  ;;  %v486_v22 = vadd.f32 %v1140_v3, %v485_v21 }
 0x135   :  { %v525_v23 = vmax.f32 %v486_v22, 0.0 }
 0x137   :  { %859 = vmatmul.msk.f32.gmra.mxu2 %vm547_vm1, %v525_v23 }
 0x13a   :  { %v403_v24 = vpop.f32.mrf.mxu0  ;;  %v488_v25 = vpop.f32.mrf.mxu1 }
 0x13b   :  { %441 = vst.msk [vmem:[%s1339_s3 + $0x28] sm:$0xff] %vm322_vm0, %v403_v24  ;;  %v489_v27 = vadd.f32 %v1140_v3, %v488_v25 }
 0x13d   :  { %v526_v29 = vmax.f32 %v489_v27, 0.0 }
 0x13f   :  { %860 = vmatmul.msk.f32.gmra.mxu2 %vm547_vm1, %v526_v29 }
 0x142   :  { %v406_v30 = vpop.f32.mrf.mxu0  ;;  %v491_v31 = vpop.f32.mrf.mxu1 }
 0x143   :  { %442 = vst.msk [vmem:[%s1339_s3 + $0x30] sm:$0xff] %vm322_vm0, %v406_v30  ;;  %v492_v32 = vadd.f32 %v1140_v3, %v491_v31 }
 0x145   :  { %v527_v33 = vmax.f32 %v492_v32, 0.0 }
 0x147   :  { %861 = vmatmul.msk.f32.gmra.mxu2 %vm547_vm1, %v527_v33 }
 0x14a   :  { %v409_v34 = vpop.f32.mrf.mxu0  ;;  %v494_v35 = vpop.f32.mrf.mxu1 }
 0x14b   :  { %443 = vst.msk [vmem:[%s1339_s3 + $0x38] sm:$0xff] %vm322_vm0, %v409_v34  ;;  %v495_v36 = vadd.f32 %v1140_v3, %v494_v35 }
 0x14d   :  { %v528_v37 = vmax.f32 %v495_v36, 0.0 }
 0x14f   :  { %862 = vmatmul.msk.f32.gmra.mxu2 %vm547_vm1, %v528_v37 }
 0x152   :  { %v412_v38 = vpop.f32.mrf.mxu0  ;;  %v497_v39 = vpop.f32.mrf.mxu1 }
 0x153   :  { %444 = vst.msk [vmem:[%s1339_s3 + $0x40] sm:$0xff] %vm322_vm0, %v412_v38  ;;  %v498_v40 = vadd.f32 %v1140_v3, %v497_v39 }
 0x155   :  { %v529_v41 = vmax.f32 %v498_v40, 0.0 }
 0x157   :  { %863 = vmatmul.msk.f32.gmra.mxu2 %vm547_vm1, %v529_v41 }
 0x15a   :  { %v415_v42 = vpop.f32.mrf.mxu0  ;;  %v500_v43 = vpop.f32.mrf.mxu1 }
 0x15b   :  { %445 = vst.msk [vmem:[%s1339_s3 + $0x48] sm:$0xff] %vm322_vm0, %v415_v42  ;;  %v501_v44 = vadd.f32 %v1140_v3, %v500_v43 }
 0x15d   :  { %v530_v45 = vmax.f32 %v501_v44, 0.0 }
 0x15f   :  { %864 = vmatmul.msk.f32.gmra.mxu2 %vm547_vm1, %v530_v45 }
 0x162   :  { %v418_v46 = vpop.f32.mrf.mxu0  ;;  %v503_v47 = vpop.f32.mrf.mxu1 }
 0x163   :  { %446 = vst.msk [vmem:[%s1339_s3 + $0x50] sm:$0xff] %vm322_vm0, %v418_v46  ;;  %v504_v48 = vadd.f32 %v1140_v3, %v503_v47 }
 0x165   :  { %v531_v49 = vmax.f32 %v504_v48, 0.0 }
 0x167   :  { %865 = vmatmul.msk.f32.gmra.mxu2 %vm547_vm1, %v531_v49 }
 0x16a   :  { %v421_v50 = vpop.f32.mrf.mxu0  ;;  %v506_v51 = vpop.f32.mrf.mxu1 }
 0x16b   :  { %447 = vst.msk [vmem:[%s1339_s3 + $0x58] sm:$0xff] %vm322_vm0, %v421_v50  ;;  %v507_v52 = vadd.f32 %v1140_v3, %v506_v51 }
 0x16d   :  { %v532_v53 = vmax.f32 %v507_v52, 0.0 }
 0x16f   :  { %866 = vmatmul.msk.f32.gmra.mxu2 %vm547_vm1, %v532_v53 }
 0x172   :  { %v424_v55 = vpop.f32.mrf.mxu0  ;;  %v509_v56 = vpop.f32.mrf.mxu1 }
 0x173   :  { %448 = vst.msk [vmem:[%s1339_s3 + $0x60] sm:$0xff] %vm322_vm0, %v424_v55  ;;  %v510_v57 = vadd.f32 %v1140_v3, %v509_v56 }
 0x175   :  { %v533_v59 = vmax.f32 %v510_v57, 0.0 }
 0x177   :  { %867 = vmatmul.msk.f32.gmra.mxu2 %vm547_vm1, %v533_v59  ;;  %v925_v59 = vld [vmem:[#allocation2 + $0x98] ss:$0 sm:$0xff] }
 0x17a   :  { %v427_v62 = vpop.f32.mrf.mxu0  ;;  %v512_v63 = vpop.f32.mrf.mxu1 }
 0x17b   :  { %449 = vst.msk [vmem:[%s1339_s3 + $0x68] sm:$0xff] %vm322_vm0, %v427_v62  ;;  %v513_v0 = vadd.f32 %v1140_v3, %v512_v63 }
 0x17d   :  { %v534_v1 = vmax.f32 %v513_v0, 0.0 }
 0x17f   :  { %868 = vmatmul.msk.f32.gmra.mxu2 %vm547_vm1, %v534_v1 }
 0x182   :  { %v430_v26 = vpop.f32.mrf.mxu0  ;;  %v515_v2 = vpop.f32.mrf.mxu1 }
 0x183   :  { %450 = vst.msk [vmem:[%s1339_s3 + $0x70] sm:$0xff] %vm322_vm0, %v430_v26  ;;  %v516_v28 = vadd.f32 %v1140_v3, %v515_v2 }
 0x185   :  { %v535_v4 = vmax.f32 %v516_v28, 0.0 }
 0x187   :  { %869 = vmatmul.msk.f32.gmra.mxu2 %vm547_vm1, %v535_v4 }
 0x18a   :  { %v433_v5 = vpop.f32.mrf.mxu0  ;;  %v518_v6 = vpop.f32.mrf.mxu1 }
 0x18b   :  { %451 = vst.msk [vmem:[%s1339_s3 + $0x78] sm:$0xff] %vm322_vm0, %v433_v5  ;;  %v519_v7 = vadd.f32 %v1140_v3, %v518_v6 }
 0x18d   :  { %v536_v8 = vmax.f32 %v519_v7, 0.0 }
 0x18f   :  { %870 = vmatmul.msk.f32.gmra.mxu2 %vm547_vm1, %v536_v8 }
 0x194   :  { %v613_v10 = vpop.f32.mrf.mxu0 }
 0x195   :  { %v614_v11 = vadd.f32 %v1238_v9, %v613_v10 }
 0x197   :  { %v661_v12 = vmax.f32 %v614_v11, 0.0 }
 0x199   :  { %871 = vmatmul.msk.f32.vlgmr.msra.gmra.mxu3 %vm683_vm2, %v661_v12 }
 0x1a2   :  { %v616_v13 = vpop.f32.mrf.mxu2 }
 0x1a3   :  { %v617_v14 = vadd.f32 %v1238_v9, %v616_v13 }
 0x1a5   :  { %v662_v15 = vmax.f32 %v617_v14, 0.0 }
 0x1a7   :  { %872 = vmatmul.msk.f32.gmra.mxu3 %vm683_vm2, %v662_v15 }
 0x1aa   :  { %v619_v16 = vpop.f32.mrf.mxu2 }
 0x1ab   :  { %v620_v3 = vadd.f32 %v1238_v9, %v619_v16 }
 0x1ad   :  { %v663_v17 = vmax.f32 %v620_v3, 0.0 }
 0x1af   :  { %873 = vmatmul.msk.f32.gmra.mxu3 %vm683_vm2, %v663_v17 }
 0x1b2   :  { %v622_v18 = vpop.f32.mrf.mxu2 }
 0x1b3   :  { %v623_v19 = vadd.f32 %v1238_v9, %v622_v18 }
 0x1b5   :  { %v664_v20 = vmax.f32 %v623_v19, 0.0 }
 0x1b7   :  { %874 = vmatmul.msk.f32.gmra.mxu3 %vm683_vm2, %v664_v20 }
 0x1ba   :  { %v625_v21 = vpop.f32.mrf.mxu2 }
 0x1bb   :  { %v626_v22 = vadd.f32 %v1238_v9, %v625_v21 }
 0x1bd   :  { %v665_v23 = vmax.f32 %v626_v22, 0.0 }
 0x1bf   :  { %875 = vmatmul.msk.f32.gmra.mxu3 %vm683_vm2, %v665_v23 }
 0x1c2   :  { %v628_v24 = vpop.f32.mrf.mxu2 }
 0x1c3   :  { %v629_v25 = vadd.f32 %v1238_v9, %v628_v24 }
 0x1c5   :  { %v666_v27 = vmax.f32 %v629_v25, 0.0 }
 0x1c7   :  { %876 = vmatmul.msk.f32.gmra.mxu3 %vm683_vm2, %v666_v27 }
 0x1ca   :  { %v631_v29 = vpop.f32.mrf.mxu2 }
 0x1cb   :  { %v632_v30 = vadd.f32 %v1238_v9, %v631_v29 }
 0x1cd   :  { %v667_v31 = vmax.f32 %v632_v30, 0.0 }
 0x1cf   :  { %877 = vmatmul.msk.f32.gmra.mxu3 %vm683_vm2, %v667_v31 }
 0x1d2   :  { %v634_v32 = vpop.f32.mrf.mxu2 }
 0x1d3   :  { %v635_v33 = vadd.f32 %v1238_v9, %v634_v32 }
 0x1d5   :  { %v668_v34 = vmax.f32 %v635_v33, 0.0 }
 0x1d7   :  { %878 = vmatmul.msk.f32.gmra.mxu3 %vm683_vm2, %v668_v34 }
 0x1da   :  { %v637_v35 = vpop.f32.mrf.mxu2 }
 0x1db   :  { %v638_v36 = vadd.f32 %v1238_v9, %v637_v35 }
 0x1dd   :  { %v669_v37 = vmax.f32 %v638_v36, 0.0 }
 0x1df   :  { %879 = vmatmul.msk.f32.gmra.mxu3 %vm683_vm2, %v669_v37 }
 0x1e2   :  { %v640_v38 = vpop.f32.mrf.mxu2 }
 0x1e3   :  { %v641_v39 = vadd.f32 %v1238_v9, %v640_v38 }
 0x1e5   :  { %v670_v40 = vmax.f32 %v641_v39, 0.0 }
 0x1e7   :  { %880 = vmatmul.msk.f32.gmra.mxu3 %vm683_vm2, %v670_v40 }
 0x1ea   :  { %v643_v41 = vpop.f32.mrf.mxu2 }
 0x1eb   :  { %v644_v42 = vadd.f32 %v1238_v9, %v643_v41 }
 0x1ed   :  { %v671_v43 = vmax.f32 %v644_v42, 0.0 }
 0x1ef   :  { %881 = vmatmul.msk.f32.gmra.mxu3 %vm683_vm2, %v671_v43 }
 0x1f2   :  { %v646_v44 = vpop.f32.mrf.mxu2 }
 0x1f3   :  { %v647_v45 = vadd.f32 %v1238_v9, %v646_v44 }
 0x1f5   :  { %v672_v46 = vmax.f32 %v647_v45, 0.0 }
 0x1f7   :  { %882 = vmatmul.msk.f32.gmra.mxu3 %vm683_vm2, %v672_v46 }
 0x1fa   :  { %v649_v47 = vpop.f32.mrf.mxu2 }
 0x1fb   :  { %v650_v48 = vadd.f32 %v1238_v9, %v649_v47 }
 0x1fd   :  { %v673_v49 = vmax.f32 %v650_v48, 0.0 }
 0x1ff   :  { %883 = vmatmul.msk.f32.gmra.mxu3 %vm683_vm2, %v673_v49 }
 0x202   :  { %v652_v50 = vpop.f32.mrf.mxu2 }
 0x203   :  { %v653_v51 = vadd.f32 %v1238_v9, %v652_v50 }
 0x205   :  { %v674_v52 = vmax.f32 %v653_v51, 0.0 }
 0x207   :  { %884 = vmatmul.msk.f32.gmra.mxu3 %vm683_vm2, %v674_v52 }
 0x20a   :  { %v655_v53 = vpop.f32.mrf.mxu2 }
 0x20b   :  { %v656_v54 = vadd.f32 %v1238_v9, %v655_v53 }
 0x20d   :  { %v675_v55 = vmax.f32 %v656_v54, 0.0 }
 0x20f   :  { %885 = vmatmul.msk.f32.gmra.mxu3 %vm683_vm2, %v675_v55 }
 0x212   :  { %v658_v56 = vpop.f32.mrf.mxu2 }
 0x213   :  { %v659_v57 = vadd.f32 %v1238_v9, %v658_v56 }
 0x215   :  { %v676_v58 = vmax.f32 %v659_v57, 0.0 }
 0x217   :  { %886 = vmatmul.msk.f32.gmra.mxu3 %vm683_vm2, %v676_v58 }
 0x21c   :  { %v749_v60 = vpop.f32.mrf.mxu3 }
 0x21d   :  { %v750_v61 = vadd.f32 %v925_v59, %v749_v60 }
 0x21f   :  { %798 = vst.msk [vmem:[%s1338_s2] sm:$0xff] %vm797_vm3, %v750_v61 }
 0x22a   :  { %v752_v62 = vpop.f32.mrf.mxu3 }
 0x22b   :  { %v753_v63 = vadd.f32 %v925_v59, %v752_v62 }
 0x22d   :  { %799 = vst.msk [vmem:[%s1338_s2 + $0x8] sm:$0xff] %vm797_vm3, %v753_v63 }
 0x232   :  { %v755_v0 = vpop.f32.mrf.mxu3 }
 0x233   :  { %v756_v1 = vadd.f32 %v925_v59, %v755_v0 }
 0x235   :  { %800 = vst.msk [vmem:[%s1338_s2 + $0x10] sm:$0xff] %vm797_vm3, %v756_v1 }
 0x23a   :  { %v758_v26 = vpop.f32.mrf.mxu3 }
 0x23b   :  { %v759_v2 = vadd.f32 %v925_v59, %v758_v26 }
 0x23d   :  { %801 = vst.msk [vmem:[%s1338_s2 + $0x18] sm:$0xff] %vm797_vm3, %v759_v2 }
 0x242   :  { %v761_v28 = vpop.f32.mrf.mxu3 }
 0x243   :  { %v762_v4 = vadd.f32 %v925_v59, %v761_v28 }
 0x245   :  { %802 = vst.msk [vmem:[%s1338_s2 + $0x20] sm:$0xff] %vm797_vm3, %v762_v4 }
 0x24a   :  { %v764_v5 = vpop.f32.mrf.mxu3 }
 0x24b   :  { %v765_v6 = vadd.f32 %v925_v59, %v764_v5 }
 0x24d   :  { %803 = vst.msk [vmem:[%s1338_s2 + $0x28] sm:$0xff] %vm797_vm3, %v765_v6 }
 0x252   :  { %v767_v7 = vpop.f32.mrf.mxu3 }
 0x253   :  { %v768_v8 = vadd.f32 %v925_v59, %v767_v7 }
 0x255   :  { %804 = vst.msk [vmem:[%s1338_s2 + $0x30] sm:$0xff] %vm797_vm3, %v768_v8 }
 0x25a   :  { %v770_v9 = vpop.f32.mrf.mxu3 }
 0x25b   :  { %v771_v10 = vadd.f32 %v925_v59, %v770_v9 }
 0x25d   :  { %805 = vst.msk [vmem:[%s1338_s2 + $0x38] sm:$0xff] %vm797_vm3, %v771_v10 }
 0x262   :  { %v773_v11 = vpop.f32.mrf.mxu3 }
 0x263   :  { %v774_v12 = vadd.f32 %v925_v59, %v773_v11 }
 0x265   :  { %806 = vst.msk [vmem:[%s1338_s2 + $0x40] sm:$0xff] %vm797_vm3, %v774_v12 }
 0x26a   :  { %v776_v13 = vpop.f32.mrf.mxu3 }
 0x26b   :  { %v777_v14 = vadd.f32 %v925_v59, %v776_v13 }
 0x26d   :  { %807 = vst.msk [vmem:[%s1338_s2 + $0x48] sm:$0xff] %vm797_vm3, %v777_v14 }
 0x272   :  { %v779_v15 = vpop.f32.mrf.mxu3 }
 0x273   :  { %v780_v16 = vadd.f32 %v925_v59, %v779_v15 }
 0x275   :  { %808 = vst.msk [vmem:[%s1338_s2 + $0x50] sm:$0xff] %vm797_vm3, %v780_v16 }
 0x27a   :  { %v782_v3 = vpop.f32.mrf.mxu3 }
 0x27b   :  { %v783_v17 = vadd.f32 %v925_v59, %v782_v3 }
 0x27d   :  { %809 = vst.msk [vmem:[%s1338_s2 + $0x58] sm:$0xff] %vm797_vm3, %v783_v17 }
 0x282   :  { %v785_v18 = vpop.f32.mrf.mxu3 }
 0x283   :  { %v786_v19 = vadd.f32 %v925_v59, %v785_v18 }
 0x285   :  { %810 = vst.msk [vmem:[%s1338_s2 + $0x60] sm:$0xff] %vm797_vm3, %v786_v19 }
 0x28a   :  { %v788_v20 = vpop.f32.mrf.mxu3 }
 0x28b   :  { %v789_v21 = vadd.f32 %v925_v59, %v788_v20 }
 0x28d   :  { %811 = vst.msk [vmem:[%s1338_s2 + $0x68] sm:$0xff] %vm797_vm3, %v789_v21 }
 0x292   :  { %v791_v22 = vpop.f32.mrf.mxu3 }
 0x293   :  { %v792_v23 = vadd.f32 %v925_v59, %v791_v22 }
 0x295   :  { %812 = vst.msk [vmem:[%s1338_s2 + $0x70] sm:$0xff] %vm797_vm3, %v792_v23 }
 0x29a   :  { %v794_v24 = vpop.f32.mrf.mxu3 }
 0x29b   :  { %v795_v25 = vadd.f32 %v925_v59, %v794_v24 }
 0x29d   :  { %813 = vst.msk [vmem:[%s1338_s2 + $0x78] sm:$0xff] %vm797_vm3, %v795_v25 }
 0x29e   :  { %822 = vsyncpa [#allocation3], 1 }

</bundles_post_ra>
